<compile_context>
chip_gen: v7x
topology: tpu7x:2x2x1
jax: 0.10.0
libtpu: 0.0.40
codegen_flags: <defaults>
</compile_context>

<pallas_src>
import functools

import jax
import jax.numpy as jnp
from jax.experimental import pallas as pl
from jax.experimental.pallas import tpu as pltpu


def _round_up(x, m):
    return (x + m - 1) // m * m


def _sublane_align(dtype):
    # Native sublane tiling: f32 -> 8, bf16/f16 -> 16, int8/fp8 -> 32.
    return max(8, 32 // jnp.dtype(dtype).itemsize)


def _choose_tile(batch, num_classes, logits_dtype):
    """Pick (rows per batch tile, scoped VMEM limit) per TPU generation."""
    try:
        vmem_cap = pltpu.get_tpu_info().vmem_capacity_bytes
    except Exception:                          # conservative fallback if query unavailable
        vmem_cap = 64 * 1024 * 1024
    if vmem_cap >= 96 * 1024 * 1024:           # v5e / v6e: 128 MiB VMEM
        tile_f32_bytes = 8 * 1024 * 1024
        vmem_limit = 64 * 1024 * 1024
    else:                                      # v7x: 64 MiB physical VMEM
        tile_f32_bytes = 4 * 1024 * 1024
        vmem_limit = 32 * 1024 * 1024
    align = _sublane_align(logits_dtype)
    tb = tile_f32_bytes // (num_classes * 4)   # sized by the f32 in-kernel working set
    tb = max(align, min(8192, (tb // align) * align))
    tb = min(tb, _round_up(batch, align))
    return max(align, tb), vmem_limit


def _pow_const(x, alpha):
    """x ** alpha for x >= 0 with compile-time-constant alpha.

    Integer alpha unrolls to VALU multiplies (exponentiation by squaring) instead of
    exp(alpha*log(x)) on the EUP; this also makes 0**alpha exactly 0."""
    a = float(alpha)
    if a.is_integer() and 0 <= a <= 64:
        n = int(a)
        if n == 0:
            return jnp.ones_like(x)
        result = None
        base = x
        while n:
            if n & 1:
                result = base if result is None else result * base
            n >>= 1
            if n:
                base = base * base
        return result
    # Non-integer alpha: transcendental fallback, guarded so 0**alpha == 0 (not NaN).
    return jnp.where(x > 0.0,
                     jnp.exp(jnp.float32(a) * jnp.log(jnp.maximum(x, 1e-30))),
                     jnp.zeros_like(x))


def _cdw_ce_kernel(logits_ref, targets_ref, weight_ref, out_ref, *, alpha, margin):
    logits = logits_ref[...].astype(jnp.float32)           # (TB, C) — upcast in VMEM
    tb, c = logits.shape

    # softmax over the class axis
    m = jnp.max(logits, axis=1, keepdims=True)
    e = jnp.exp(logits - m)
    denom = jnp.sum(e, axis=1, keepdims=True)
    probs = e * pl.reciprocal(denom)                        # exact reciprocal

    # additive margin, clamped to max=1.0
    adjusted = jnp.minimum(probs + jnp.float32(margin), 1.0)
    # Faithful to the PyTorch module: log(1 - clamp(adjusted, min=1e-6)).
    # (Hazard carried over from the reference: if probs + margin >= 1 this is log(0) = -inf.)
    log_term = jnp.log(1.0 - jnp.maximum(adjusted, 1e-6))

    # class-distance penalty |class - target|^alpha, weighted per class
    class_idx = jax.lax.broadcasted_iota(jnp.int32, (tb, c), 1)
    tgt = targets_ref[...]                                  # (TB, 1) int32
    dist = jnp.abs(class_idx - tgt).astype(jnp.float32)
    penalties = _pow_const(dist, alpha) * weight_ref[...]   # (1, C) broadcast

    # Per-sample weighted sums. Rows of a ragged last block that lie past the real batch
    # are dropped by the clipped output writeback, so no explicit masking is needed.
    out_ref[...] = jnp.sum(log_term * penalties, axis=1, keepdims=True)


def cdw_ce_loss(logits, targets, weight=None, *, alpha=5.0, margin=0.05, block_rows=None):
    """Pallas implementation of CDW_CELoss.forward. Returns a scalar f32 loss."""
    B, C = logits.shape
    align = _sublane_align(logits.dtype)
    tb, vmem_limit = _choose_tile(B, C, logits.dtype)
    if block_rows is not None:
        tb = max(align, _round_up(int(block_rows), align))
        tb = min(tb, _round_up(B, align))
    num_blocks = pl.cdiv(B, tb)

    targets2 = targets.astype(jnp.int32).reshape(B, 1)      # tiny: B int32s
    w = jnp.ones((C,), jnp.float32) if weight is None else weight.astype(jnp.float32)
    weight2 = w.reshape(1, C)

    kernel = functools.partial(_cdw_ce_kernel, alpha=alpha, margin=margin)

    per_sample = pl.pallas_call(
        kernel,
        out_shape=jax.ShapeDtypeStruct((B, 1), jnp.float32),
        grid_spec=pltpu.PrefetchScalarGridSpec(
            num_scalar_prefetch=0,
            grid=(num_blocks,),
            in_specs=[
                pl.BlockSpec((tb, C), lambda i: (i, 0)),    # logits tile, native dtype
                pl.BlockSpec((tb, 1), lambda i: (i, 0)),    # targets tile
                pl.BlockSpec((1, C), lambda i: (0, 0)),     # class weights (resident)
            ],
            out_specs=pl.BlockSpec((tb, 1), lambda i: (i, 0)),  # per-sample sums
        ),
        compiler_params=pltpu.CompilerParams(
            dimension_semantics=("parallel",),              # independent batch tiles
            vmem_limit_bytes=vmem_limit,
        ),
    )(logits, targets2, weight2)

    return -jnp.sum(per_sample) / jnp.float32(B)


def _cdw_ce_loss_ref(logits, targets, weight=None, *, alpha=5.0, margin=0.05):
    """Pure-JAX reference mirroring the PyTorch forward exactly (f32 compute)."""
    probs = jax.nn.softmax(logits.astype(jnp.float32), axis=1)
    B, C = probs.shape
    adjusted = jnp.minimum(probs + margin, 1.0)
    class_idx = jnp.arange(C)[None, :]
    dist = jnp.abs(class_idx - targets.reshape(-1, 1)).astype(jnp.float32)
    penalties = jnp.power(dist, jnp.float32(alpha))
    log_term = jnp.log(1.0 - jnp.maximum(adjusted, 1e-6))
    if weight is not None:
        penalties = penalties * weight.reshape(1, -1)
    return -(jnp.sum(log_term * penalties, axis=1)).mean()


if __name__ == "__main__":
    key = jax.random.PRNGKey(0)
    (k_logits, k_targets, k_weight,
     k2_logits, k2_targets, k3_logits, k3_targets) = jax.random.split(key, 7)

    # Small test (matches the module's typical use): batch=8, classes=16.
    batch, num_classes = 8, 16
    logits = jax.random.normal(k_logits, (batch, num_classes), jnp.float32)
    targets = jax.random.randint(k_targets, (batch,), 0, num_classes, jnp.int32)
    weight = jax.random.uniform(k_weight, (num_classes,), jnp.float32, 0.5, 1.5)

    loss = jax.block_until_ready(cdw_ce_loss(logits, targets, weight))
    loss_nw = jax.block_until_ready(cdw_ce_loss(logits, targets, None))
    ref = _cdw_ce_loss_ref(logits, targets, weight)
    ref_nw = _cdw_ce_loss_ref(logits, targets, None)
    assert jnp.allclose(loss, ref, rtol=1e-5, atol=1e-5), (loss, ref)
    assert jnp.allclose(loss_nw, ref_nw, rtol=1e-5, atol=1e-5), (loss_nw, ref_nw)

    # Multi-block grid with a ragged last block and no host-side padding:
    # B=300 is not a multiple of the 128-row tile, C=40 is not a multiple of 128.
    batch2, classes2 = 300, 40
    logits2 = jax.random.normal(k2_logits, (batch2, classes2), jnp.float32)
    targets2 = jax.random.randint(k2_targets, (batch2,), 0, classes2, jnp.int32)
    loss2 = jax.block_until_ready(cdw_ce_loss(logits2, targets2, None, block_rows=128))
    ref2 = _cdw_ce_loss_ref(logits2, targets2, None)
    assert jnp.allclose(loss2, ref2, rtol=1e-4, atol=1e-2), (loss2, ref2)

    # bf16 logits: DMA'd in native dtype, upcast to f32 inside the kernel.
    batch3, classes3 = 64, 16
    logits3 = jax.random.normal(k3_logits, (batch3, classes3), jnp.float32).astype(jnp.bfloat16)
    targets3 = jax.random.randint(k3_targets, (batch3,), 0, classes3, jnp.int32)
    loss3 = jax.block_until_ready(cdw_ce_loss(logits3, targets3, None))
    ref3 = _cdw_ce_loss_ref(logits3, targets3, None)
    assert jnp.allclose(loss3, ref3, rtol=1e-4, atol=1e-2), (loss3, ref3)

    print("KERNEL_OK")
</pallas_src>

<mosaic_0001>
module attributes {stable_mosaic.version = 11 : i64} {
  func.func @_cdw_ce_kernel(%arg0: i32, %arg1: memref<8x16xf32, #tpu.memory_space<vmem>>, %arg2: memref<8x1xi32, #tpu.memory_space<vmem>>, %arg3: memref<1x16xf32, #tpu.memory_space<vmem>>, %arg4: memref<8x1xf32, #tpu.memory_space<vmem>>) attributes {dimension_semantics = [#tpu.dimension_semantics<parallel>], iteration_bounds = array<i64: 1>, scalar_prefetch = 0 : i64, scratch_operands = 0 : i64, tpu.core_type = #tpu.core_type<tc>, window_params = [{transform_indices = @transform_0, window_bounds = array<i64: 8, 16>}, {transform_indices = @transform_1, window_bounds = array<i64: 8, 1>}, {pipeline_mode = #tpu.pipeline_mode<synchronous>, transform_indices = @transform_2, window_bounds = array<i64: 1, 16>}, {transform_indices = @transform_3, window_bounds = array<i64: 8, 1>}]} {
    %c0 = arith.constant 0 : index
    %c0_0 = arith.constant 0 : index
    %0 = vector.load %arg1[%c0, %c0_0] : memref<8x16xf32, #tpu.memory_space<vmem>>, vector<8x16xf32>
    %cst = arith.constant dense<0xFF800000> : vector<8xf32>
    %1 = vector.multi_reduction <maximumf>, %0, %cst [1] : vector<8x16xf32> to vector<8xf32>
    %2 = vector.shape_cast %1 : vector<8xf32> to vector<8x1xf32>
    %3 = vector.broadcast %2 : vector<8x1xf32> to vector<8x16xf32>
    %4 = arith.subf %0, %3 : vector<8x16xf32>
    %5 = math.exp %4 : vector<8x16xf32>
    %cst_1 = arith.constant dense<0.000000e+00> : vector<8xf32>
    %6 = vector.multi_reduction <add>, %5, %cst_1 [1] : vector<8x16xf32> to vector<8xf32>
    %7 = vector.shape_cast %6 : vector<8xf32> to vector<8x1xf32>
    %8 = tpu.reciprocal %7 : vector<8x1xf32> -> vector<8x1xf32>
    %9 = vector.broadcast %8 : vector<8x1xf32> to vector<8x16xf32>
    %10 = arith.mulf %5, %9 : vector<8x16xf32>
    %cst_2 = arith.constant 5.000000e-02 : f32
    %11 = vector.broadcast %cst_2 : f32 to vector<8x16xf32>
    %12 = arith.addf %10, %11 : vector<8x16xf32>
    %cst_3 = arith.constant 1.000000e+00 : f32
    %13 = vector.broadcast %cst_3 : f32 to vector<8x16xf32>
    %14 = arith.minimumf %12, %13 : vector<8x16xf32>
    %cst_4 = arith.constant 9.99999997E-7 : f32
    %15 = vector.broadcast %cst_4 : f32 to vector<8x16xf32>
    %16 = arith.maximumf %14, %15 : vector<8x16xf32>
    %cst_5 = arith.constant 1.000000e+00 : f32
    %17 = vector.broadcast %cst_5 : f32 to vector<8x16xf32>
    %18 = arith.subf %17, %16 : vector<8x16xf32>
    %19 = math.log %18 : vector<8x16xf32>
    %20 = tpu.iota {dimensions = array<i32: 1>} : vector<8x16xi32>
    %c0_6 = arith.constant 0 : index
    %c0_7 = arith.constant 0 : index
    %21 = vector.load %arg2[%c0_6, %c0_7] : memref<8x1xi32, #tpu.memory_space<vmem>>, vector<8x1xi32>
    %22 = vector.broadcast %21 : vector<8x1xi32> to vector<8x16xi32>
    %23 = arith.subi %20, %22 : vector<8x16xi32>
    %24 = math.absi %23 : vector<8x16xi32>
    %25 = arith.sitofp %24 : vector<8x16xi32> to vector<8x16xf32>
    %26 = arith.mulf %25, %25 : vector<8x16xf32>
    %27 = arith.mulf %26, %26 : vector<8x16xf32>
    %28 = arith.mulf %25, %27 : vector<8x16xf32>
    %c0_8 = arith.constant 0 : index
    %c0_9 = arith.constant 0 : index
    %29 = vector.load %arg3[%c0_8, %c0_9] : memref<1x16xf32, #tpu.memory_space<vmem>>, vector<1x16xf32>
    %30 = vector.broadcast %29 : vector<1x16xf32> to vector<8x16xf32>
    %31 = arith.mulf %28, %30 : vector<8x16xf32>
    %32 = arith.mulf %19, %31 : vector<8x16xf32>
    %cst_10 = arith.constant dense<0.000000e+00> : vector<8xf32>
    %33 = vector.multi_reduction <add>, %32, %cst_10 [1] : vector<8x16xf32> to vector<8xf32>
    %34 = vector.shape_cast %33 : vector<8xf32> to vector<8x1xf32>
    %c0_11 = arith.constant 0 : index
    %c0_12 = arith.constant 0 : index
    %35 = vector.load %arg4[%c0_11, %c0_12] : memref<8x1xf32, #tpu.memory_space<vmem>>, vector<8x1xf32>
    tpu.vector_store %arg4[%c0_11, %c0_12], %34 {strides = array<i32>} : memref<8x1xf32, #tpu.memory_space<vmem>>, vector<8x1xf32>,
    return
  }
  func.func @transform_0(%arg0: i32) -> (i32, i32) {
    %c0_i32 = arith.constant 0 : i32
    %c0_i32_0 = arith.constant 0 : i32
    return %arg0, %c0_i32 : i32, i32
  }
  func.func @transform_1(%arg0: i32) -> (i32, i32) {
    %c0_i32 = arith.constant 0 : i32
    %c0_i32_0 = arith.constant 0 : i32
    return %arg0, %c0_i32 : i32, i32
  }
  func.func @transform_2(%arg0: i32) -> (i32, i32) {
    %c0_i32 = arith.constant 0 : i32
    %c0_i32_0 = arith.constant 0 : i32
    %c0_i32_1 = arith.constant 0 : i32
    return %c0_i32, %c0_i32_0 : i32, i32
  }
  func.func @transform_3(%arg0: i32) -> (i32, i32) {
    %c0_i32 = arith.constant 0 : i32
    %c0_i32_0 = arith.constant 0 : i32
    return %arg0, %c0_i32 : i32, i32
  }
}

</mosaic_0001>

<bundles_post_ra>
// kernel: tpu_custom_call.1
= control target key start
LH: loop header
LB: loop body
LE: loop exit
PB: predicated region body
PF: predicated region fallthrough
CT: control target
= control target key end

     0   :  { %vm15_vm0 = vcmask 130048   ;;  %v76_v2 = vmov 0   ;;  %v33_v9 = vlaneseq  ;;  %vm59_vm1 = vcmask 7168   ;;  %s112_s0 = inlined_call_operand.vmem [shape: f32[8,16], index: 0, kind: input, shape index: {}]   ;;  %s113_s1 = inlined_call_operand.vmem [shape: s32[8,1], index: 1, kind: input, shape index: {}]   ;;  %s114_s2 = inlined_call_operand.vmem [shape: f32[1,16], index: 2, kind: input, shape index: {}]   ;;  %s115_s3 = inlined_call_operand.vmem [shape: f32[8,1], index: 3, kind: output, shape index: {}]  }
   0x1   :  { %v14_v0 = vld [vmem:[%s112_s0] sm:$0xff]  ;;  %68 = vset.pattern.permute.xlu1 %v76_v2  ;;  %69 = vset.pattern.permute.xlu0 %v76_v2 }
   0x2   :  { %v16_v1 = vsel %vm15_vm0, %v14_v0, -inf  ;;  %v35_v3 = vld [vmem:[%s113_s1] sm:$0xff]  ;;  %v34_v11 = vand.u32 127, %v33_v9 }
   0x3   :  { %17 = vmax.xlane.f32.xlu0 %v16_v1  ;;  %37 = vperm.xlu1 %68, %v35_v3   ;;  %v66_v26 = vld [vmem:[%s114_s2] ss:$0 sm:$0xff] }
  0x82   :  { %v38_v12 = vpop.permute.xlu1 %37 }
  0x83   :  { %v39_v13 = vsub.s32 %v34_v11, %v38_v12 }
  0x85   :  { %v41_v14 = vsub.s32 0, %v39_v13 }
  0x87   :  { %v65_v17 = vmin.u32 %v41_v14, %v39_v13 }
  0x89   :  { %v43_v20 = vcvt.s32.f32 %v65_v17 }
  0x8b   :  { %v44_v23 = vmul.f32 %v43_v20, %v43_v20 }
  0x8d   :  { %v45_v24 = vmul.f32 %v44_v23, %v44_v23 }
  0x8f   :  { %v46_v25 = vmul.f32 %v45_v24, %v43_v20 }
  0x90   :  { %v18_v4 = vpop.xlane.xlu0 %17 }
  0x91   :  { %v19_v5 = vsub.f32 %v14_v0, %v18_v4  ;;  %v54_v29 = vmul.f32 %v66_v26, %v46_v25 }
  0x93   :  { %v20_v6 = vmul.f32 1.442695, %v19_v5 }
  0x95   :  { %70 = vpow2.f32 %v20_v6 }
  0x9f   :  { %v71_v7 = vpop.eup %70 }
  0xa0   :  { %v22_v8 = vsel %vm15_vm0, %v71_v7, 0.0 }
  0xa1   :  { %23 = vadd.xlane.f32.xlu0 %v22_v8 }
 0x12e   :  { %v24_v10 = vpop.xlane.xlu0 %23 }
 0x12f   :  { %72 = vrcp.f32 %v24_v10 }
 0x139   :  { %v73_v15 = vpop.eup %72 }
 0x13a   :  { %v26_v16 = vmul.f32 %v73_v15, %v71_v7 }
 0x13c   :  { %v27_v18 = vadd.f32 0.05, %v26_v16 }
 0x13e   :  { %v28_v19 = vmin.f32 %v27_v18, 1.0 }
 0x140   :  { %v29_v21 = vmax.f32 %v28_v19, 1e-06 }
 0x142   :  { %v30_v22 = vsub.f32 1.0, %v29_v21 }
 0x144   :  { %74 = vlog2.f32 %v30_v22 }
 0x14e   :  { %v75_v27 = vpop.eup %74 }
 0x14f   :  { %v32_v28 = vmul.f32 0.6931472, %v75_v27 }
 0x151   :  { %v55_v30 = vmul.f32 %v54_v29, %v32_v28 }
 0x153   :  { %v56_v31 = vsel %vm15_vm0, %v55_v30, 0.0 }
 0x154   :  { %57 = vadd.xlane.f32.xlu1 %v56_v31 }
 0x1e1   :  { %v58_v32 = vpop.xlane.xlu1 %57 }
 0x1e2   :  { %60 = vst.msk [vmem:[%s115_s3] sm:$0xff] %vm59_vm1, %v58_v32 }

</bundles_post_ra>
